<compile_context>
chip_gen: v7x
topology: tpu7x:2x2x1
jax: 0.10.0
libtpu: 0.0.40
codegen_flags: <defaults>
</compile_context>

<pallas_src>
import functools

import jax
import jax.numpy as jnp
from jax.experimental import pallas as pl
from jax.experimental.pallas import tpu as pltpu


def _se_kernel(x_ref, w1_ref, b1_ref, w2_ref, b2_ref, o_ref, *, inv_hw):
    bt, _, hw_pad = x_ref.shape

    # Fully VMEM-resident parameters; load once per grid step.
    w1 = w1_ref[...]          # (F, C)
    b1 = b1_ref[...]          # (F, 1)
    w2 = w2_ref[...]          # (C, F)
    b2 = b2_ref[...]          # (C, 1)

    # Ones vector for the spatial-sum matvec (hoisted out of the sample loop).
    ones_hw = jnp.ones((hw_pad, 1), dtype=jnp.float32)

    # Small, fully unrolled loop over the samples in this block (bt <= 8).
    for i in range(bt):
        x = x_ref[i]                                              # (C, hw_pad)
        xf = x.astype(jnp.float32)

        # AdaptiveAvgPool2d(1): spatial sum via MXU matvec, one scalar mul.
        # Real HW (not padded) is the divisor, so zero padding stays exact.
        pooled = jnp.dot(xf, ones_hw,
                         preferred_element_type=jnp.float32) * inv_hw   # (C, 1)

        # Linear(C -> F) + ReLU  (PyTorch (out, in) layout; column vectors).
        h = jnp.dot(w1, pooled, preferred_element_type=jnp.float32) + b1  # (F, 1)
        h = jnp.maximum(h, 0.0)

        # Linear(F -> C) + Sigmoid.
        a = jnp.dot(w2, h, preferred_element_type=jnp.float32) + b2      # (C, 1)
        att = jax.nn.sigmoid(a)                                          # (C, 1)

        # Per-channel scale, broadcast over the (padded) spatial lanes.
        o_ref[i] = (att * x).astype(o_ref.dtype)


def _pick_batch_tile(batch, per_sample_bytes, max_block_bytes=2 << 20, max_bt=8):
    """Largest divisor of `batch` (<= max_bt) whose block fits the byte budget."""
    bt = 1
    for d in range(1, min(batch, max_bt) + 1):
        if batch % d == 0 and d * per_sample_bytes <= max_block_bytes:
            bt = d
    return bt


def se_block(x, w1, b1, w2, b2):
    """x: (B, C, H, W).
    w1: (F, C), b1: (F,), w2: (C, F), b2: (C,)  -- PyTorch Linear layout."""
    B, C, H, W = x.shape
    F = w1.shape[0]
    hw = H * W
    hw_pad = ((hw + 127) // 128) * 128          # lane-dense last axis

    x_flat = x.reshape(B, C, hw)
    if hw_pad != hw:
        x_flat = jnp.pad(x_flat, ((0, 0), (0, 0), (0, hw_pad - hw)))

    b1_col = b1.reshape(F, 1)
    b2_col = b2.reshape(C, 1)

    itemsize = jnp.dtype(x.dtype).itemsize
    per_sample_bytes = C * hw_pad * itemsize
    bt = _pick_batch_tile(B, per_sample_bytes)

    # VMEM budget: double-buffered input + output block + resident weights.
    block_bytes = bt * per_sample_bytes
    weight_bytes = (F * C + F + C * F + C) * 4
    vmem_limit = int(min(48 << 20,
                         max(16 << 20, 4 * block_bytes + weight_bytes + (2 << 20))))

    kernel = functools.partial(_se_kernel, inv_hw=1.0 / hw)

    out_flat = pl.pallas_call(
        kernel,
        out_shape=jax.ShapeDtypeStruct((B, C, hw_pad), x.dtype),
        grid=(B // bt,),
        in_specs=[
            pl.BlockSpec((bt, C, hw_pad), lambda b: (b, 0, 0)),   # x, per batch tile
            pl.BlockSpec((F, C), lambda b: (0, 0)),               # w1 (resident)
            pl.BlockSpec((F, 1), lambda b: (0, 0)),               # b1
            pl.BlockSpec((C, F), lambda b: (0, 0)),               # w2
            pl.BlockSpec((C, 1), lambda b: (0, 0)),               # b2
        ],
        out_specs=pl.BlockSpec((bt, C, hw_pad), lambda b: (b, 0, 0)),
        compiler_params=pltpu.CompilerParams(
            dimension_semantics=("parallel",),
            vmem_limit_bytes=vmem_limit,
        ),
    )(x_flat, w1, b1_col, w2, b2_col)

    if hw_pad != hw:
        out_flat = out_flat[:, :, :hw]
    return out_flat.reshape(B, C, H, W)


def _reference(x, w1, b1, w2, b2):
    pooled = jnp.mean(x, axis=(2, 3))                   # (B, C)
    h = jnp.maximum(pooled @ w1.T + b1, 0.0)            # (B, F)
    att = jax.nn.sigmoid(h @ w2.T + b2)                 # (B, C)
    return att[:, :, None, None] * x


if __name__ == "__main__":
    B, C, H, W = 2, 4, 16, 16        # in_feature = C = 4
    F = 8                            # out_feature (hidden) = 8

    key = jax.random.PRNGKey(0)
    kx, k1, k2, k3, k4 = jax.random.split(key, 5)

    x = jax.random.normal(kx, (B, C, H, W), dtype=jnp.float32)
    # nn.Linear(in, out).weight has shape (out, in) -- keep PyTorch layout.
    w1 = 0.5 * jax.random.normal(k1, (F, C), dtype=jnp.float32)   # Linear(C->F)
    b1 = 0.1 * jax.random.normal(k2, (F,), dtype=jnp.float32)
    w2 = 0.5 * jax.random.normal(k3, (C, F), dtype=jnp.float32)   # Linear(F->C)
    b2 = 0.1 * jax.random.normal(k4, (C,), dtype=jnp.float32)

    out = se_block(x, w1, b1, w2, b2)
    out = jax.block_until_ready(out)

    ref = _reference(x, w1, b1, w2, b2)
    assert out.shape == (B, C, H, W)
    assert jnp.allclose(out, ref, atol=1e-5, rtol=1e-5), "mismatch vs reference"

    print("KERNEL_OK")
</pallas_src>

<mosaic_0001>
module attributes {stable_mosaic.version = 11 : i64} {
  func.func @_se_kernel(%arg0: i32, %arg1: memref<2x4x256xf32, #tpu.memory_space<vmem>>, %arg2: memref<8x4xf32, #tpu.memory_space<vmem>>, %arg3: memref<8x1xf32, #tpu.memory_space<vmem>>, %arg4: memref<4x8xf32, #tpu.memory_space<vmem>>, %arg5: memref<4x1xf32, #tpu.memory_space<vmem>>, %arg6: memref<2x4x256xf32, #tpu.memory_space<vmem>>) attributes {dimension_semantics = [#tpu.dimension_semantics<parallel>], iteration_bounds = array<i64: 1>, scalar_prefetch = 0 : i64, scratch_operands = 0 : i64, tpu.core_type = #tpu.core_type<tc>, window_params = [{transform_indices = @transform_0, window_bounds = array<i64: 2, 4, 256>}, {pipeline_mode = #tpu.pipeline_mode<synchronous>, transform_indices = @transform_1, window_bounds = array<i64: 8, 4>}, {pipeline_mode = #tpu.pipeline_mode<synchronous>, transform_indices = @transform_2, window_bounds = array<i64: 8, 1>}, {pipeline_mode = #tpu.pipeline_mode<synchronous>, transform_indices = @transform_3, window_bounds = array<i64: 4, 8>}, {pipeline_mode = #tpu.pipeline_mode<synchronous>, transform_indices = @transform_4, window_bounds = array<i64: 4, 1>}, {transform_indices = @transform_5, window_bounds = array<i64: 2, 4, 256>}]} {
    %c0 = arith.constant 0 : index
    %c0_0 = arith.constant 0 : index
    %0 = vector.load %arg2[%c0, %c0_0] : memref<8x4xf32, #tpu.memory_space<vmem>>, vector<8x4xf32>
    %c0_1 = arith.constant 0 : index
    %c0_2 = arith.constant 0 : index
    %1 = vector.load %arg3[%c0_1, %c0_2] : memref<8x1xf32, #tpu.memory_space<vmem>>, vector<8x1xf32>
    %c0_3 = arith.constant 0 : index
    %c0_4 = arith.constant 0 : index
    %2 = vector.load %arg4[%c0_3, %c0_4] : memref<4x8xf32, #tpu.memory_space<vmem>>, vector<4x8xf32>
    %c0_5 = arith.constant 0 : index
    %c0_6 = arith.constant 0 : index
    %3 = vector.load %arg5[%c0_5, %c0_6] : memref<4x1xf32, #tpu.memory_space<vmem>>, vector<4x1xf32>
    %cst = arith.constant 1.000000e+00 : f32
    %4 = vector.broadcast %cst : f32 to vector<256x1xf32>
    %c0_7 = arith.constant 0 : index
    %c0_8 = arith.constant 0 : index
    %c0_9 = arith.constant 0 : index
    %5 = vector.load %arg1[%c0_7, %c0_8, %c0_9] : memref<2x4x256xf32, #tpu.memory_space<vmem>>, vector<1x4x256xf32>
    %6 = vector.shape_cast %5 : vector<1x4x256xf32> to vector<4x256xf32>
    %cst_10 = arith.constant dense<0.000000e+00> : vector<4x1xf32>
    %7 = tpu.matmul %6, %4, %cst_10 {dimension_numbers = #tpu.dot_dimension_numbers<[1], [0], [0], [1], [0, 0, 1, 1], [], []>} : vector<4x256xf32>, vector<256x1xf32>, vector<4x1xf32> -> vector<4x1xf32>
    %cst_11 = arith.constant 3.906250e-03 : f32
    %8 = vector.broadcast %cst_11 : f32 to vector<4x1xf32>
    %9 = arith.mulf %7, %8 : vector<4x1xf32>
    %cst_12 = arith.constant dense<0.000000e+00> : vector<8x1xf32>
    %10 = tpu.matmul %0, %9, %cst_12 {dimension_numbers = #tpu.dot_dimension_numbers<[1], [0], [0], [1], [0, 0, 1, 1], [], []>} : vector<8x4xf32>, vector<4x1xf32>, vector<8x1xf32> -> vector<8x1xf32>
    %11 = arith.addf %10, %1 : vector<8x1xf32>
    %cst_13 = arith.constant 0.000000e+00 : f32
    %12 = vector.broadcast %cst_13 : f32 to vector<8x1xf32>
    %13 = arith.maximumf %11, %12 : vector<8x1xf32>
    %cst_14 = arith.constant dense<0.000000e+00> : vector<4x1xf32>
    %14 = tpu.matmul %2, %13, %cst_14 {dimension_numbers = #tpu.dot_dimension_numbers<[1], [0], [0], [1], [0, 0, 1, 1], [], []>} : vector<4x8xf32>, vector<8x1xf32>, vector<4x1xf32> -> vector<4x1xf32>
    %15 = arith.addf %14, %3 : vector<4x1xf32>
    %16 = arith.negf %15 : vector<4x1xf32>
    %17 = math.exp %16 : vector<4x1xf32>
    %cst_15 = arith.constant 1.000000e+00 : f32
    %18 = vector.broadcast %cst_15 : f32 to vector<4x1xf32>
    %19 = arith.addf %18, %17 : vector<4x1xf32>
    %20 = arith.divf %18, %19 : vector<4x1xf32>
    %21 = vector.broadcast %20 : vector<4x1xf32> to vector<4x256xf32>
    %22 = arith.mulf %21, %6 : vector<4x256xf32>
    %c0_16 = arith.constant 0 : index
    %c0_17 = arith.constant 0 : index
    %c0_18 = arith.constant 0 : index
    %23 = vector.load %arg6[%c0_16, %c0_17, %c0_18] : memref<2x4x256xf32, #tpu.memory_space<vmem>>, vector<1x4x256xf32>
    %24 = vector.shape_cast %23 : vector<1x4x256xf32> to vector<4x256xf32>
    %25 = vector.shape_cast %22 : vector<4x256xf32> to vector<1x4x256xf32>
    tpu.vector_store %arg6[%c0_16, %c0_17, %c0_18], %25 {strides = array<i32>} : memref<2x4x256xf32, #tpu.memory_space<vmem>>, vector<1x4x256xf32>,
    %c1 = arith.constant 1 : index
    %c0_19 = arith.constant 0 : index
    %c0_20 = arith.constant 0 : index
    %26 = vector.load %arg1[%c1, %c0_19, %c0_20] : memref<2x4x256xf32, #tpu.memory_space<vmem>>, vector<1x4x256xf32>
    %27 = vector.shape_cast %26 : vector<1x4x256xf32> to vector<4x256xf32>
    %cst_21 = arith.constant dense<0.000000e+00> : vector<4x1xf32>
    %28 = tpu.matmul %27, %4, %cst_21 {dimension_numbers = #tpu.dot_dimension_numbers<[1], [0], [0], [1], [0, 0, 1, 1], [], []>} : vector<4x256xf32>, vector<256x1xf32>, vector<4x1xf32> -> vector<4x1xf32>
    %cst_22 = arith.constant 3.906250e-03 : f32
    %29 = vector.broadcast %cst_22 : f32 to vector<4x1xf32>
    %30 = arith.mulf %28, %29 : vector<4x1xf32>
    %cst_23 = arith.constant dense<0.000000e+00> : vector<8x1xf32>
    %31 = tpu.matmul %0, %30, %cst_23 {dimension_numbers = #tpu.dot_dimension_numbers<[1], [0], [0], [1], [0, 0, 1, 1], [], []>} : vector<8x4xf32>, vector<4x1xf32>, vector<8x1xf32> -> vector<8x1xf32>
    %32 = arith.addf %31, %1 : vector<8x1xf32>
    %cst_24 = arith.constant 0.000000e+00 : f32
    %33 = vector.broadcast %cst_24 : f32 to vector<8x1xf32>
    %34 = arith.maximumf %32, %33 : vector<8x1xf32>
    %cst_25 = arith.constant dense<0.000000e+00> : vector<4x1xf32>
    %35 = tpu.matmul %2, %34, %cst_25 {dimension_numbers = #tpu.dot_dimension_numbers<[1], [0], [0], [1], [0, 0, 1, 1], [], []>} : vector<4x8xf32>, vector<8x1xf32>, vector<4x1xf32> -> vector<4x1xf32>
    %36 = arith.addf %35, %3 : vector<4x1xf32>
    %37 = arith.negf %36 : vector<4x1xf32>
    %38 = math.exp %37 : vector<4x1xf32>
    %cst_26 = arith.constant 1.000000e+00 : f32
    %39 = vector.broadcast %cst_26 : f32 to vector<4x1xf32>
    %40 = arith.addf %39, %38 : vector<4x1xf32>
    %41 = arith.divf %39, %40 : vector<4x1xf32>
    %42 = vector.broadcast %41 : vector<4x1xf32> to vector<4x256xf32>
    %43 = arith.mulf %42, %27 : vector<4x256xf32>
    %c1_27 = arith.constant 1 : index
    %c0_28 = arith.constant 0 : index
    %c0_29 = arith.constant 0 : index
    %44 = vector.load %arg6[%c1_27, %c0_28, %c0_29] : memref<2x4x256xf32, #tpu.memory_space<vmem>>, vector<1x4x256xf32>
    %45 = vector.shape_cast %44 : vector<1x4x256xf32> to vector<4x256xf32>
    %46 = vector.shape_cast %43 : vector<4x256xf32> to vector<1x4x256xf32>
    tpu.vector_store %arg6[%c1_27, %c0_28, %c0_29], %46 {strides = array<i32>} : memref<2x4x256xf32, #tpu.memory_space<vmem>>, vector<1x4x256xf32>,
    return
  }
  func.func @transform_0(%arg0: i32) -> (i32, i32, i32) {
    %c0_i32 = arith.constant 0 : i32
    %c0_i32_0 = arith.constant 0 : i32
    %c0_i32_1 = arith.constant 0 : i32
    return %arg0, %c0_i32, %c0_i32_0 : i32, i32, i32
  }
  func.func @transform_1(%arg0: i32) -> (i32, i32) {
    %c0_i32 = arith.constant 0 : i32
    %c0_i32_0 = arith.constant 0 : i32
    %c0_i32_1 = arith.constant 0 : i32
    return %c0_i32, %c0_i32_0 : i32, i32
  }
  func.func @transform_2(%arg0: i32) -> (i32, i32) {
    %c0_i32 = arith.constant 0 : i32
    %c0_i32_0 = arith.constant 0 : i32
    %c0_i32_1 = arith.constant 0 : i32
    return %c0_i32, %c0_i32_0 : i32, i32
  }
  func.func @transform_3(%arg0: i32) -> (i32, i32) {
    %c0_i32 = arith.constant 0 : i32
    %c0_i32_0 = arith.constant 0 : i32
    %c0_i32_1 = arith.constant 0 : i32
    return %c0_i32, %c0_i32_0 : i32, i32
  }
  func.func @transform_4(%arg0: i32) -> (i32, i32) {
    %c0_i32 = arith.constant 0 : i32
    %c0_i32_0 = arith.constant 0 : i32
    %c0_i32_1 = arith.constant 0 : i32
    return %c0_i32, %c0_i32_0 : i32, i32
  }
  func.func @transform_5(%arg0: i32) -> (i32, i32, i32) {
    %c0_i32 = arith.constant 0 : i32
    %c0_i32_0 = arith.constant 0 : i32
    %c0_i32_1 = arith.constant 0 : i32
    return %arg0, %c0_i32, %c0_i32_0 : i32, i32, i32
  }
}

</mosaic_0001>

<bundles_post_ra>
// kernel: tpu_custom_call.1
= control target key start
LH: loop header
LB: loop body
LE: loop exit
PB: predicated region body
PF: predicated region fallthrough
CT: control target
= control target key end

     0   :  { %s844_s0 = inlined_call_operand.vmem [shape: f32[2,4,256], index: 0, kind: input, shape index: {}]   ;;  %s845_s1 = inlined_call_operand.vmem [shape: f32[8,4], index: 1, kind: input, shape index: {}]   ;;  %s846_s2 = inlined_call_operand.vmem [shape: f32[8,1], index: 2, kind: input, shape index: {}]   ;;  %s847_s3 = inlined_call_operand.vmem [shape: f32[4,8], index: 3, kind: input, shape index: {}]   ;;  %s848_s4 = inlined_call_operand.vmem [shape: f32[4,1], index: 4, kind: input, shape index: {}]   ;;  %s849_s5 = inlined_call_operand.hbm [shape: f32[2,4,256], index: 5, kind: output, shape index: {}]  }
   0x1   :  { %v747_v0 = vld [vmem:[%s844_s0] sm:$0xff] }
   0x2   :  { %10 = vsyncpa [#allocation3], 0  ;;  %v707_v1 = vmov 1.0|1.0   ;;  %v752_v2 = vcombine.high %v747_v0, %v747_v0  ;;  %v708_v3 = vmov 0.0   ;;  %vm709_vm0 = vmmov 0  }
   0x3   :  { %633 = vmatprep.subr.bf16.mxu0 %v707_v1  ;;  %613 = vmatprep.subr.mxu1 %v708_v3  ;;  %vm104_vm1 = vcmask 1043456   ;;  %v21_v8 = vld [vmem:[%s845_s1] sm:$0xff]  ;;  %vm100_vm2 = vcmask 31744   ;;  %v791_v11 = vld [vmem:[%s844_s0 + $0x8] sm:$0xff]  ;;  %vm179_vm3 = vcmask 64512   ;;  %v710_v17 = vmov 0  }
   0x4   :  { %634 = vmatpush3.bf16.msra.mxu0 %v707_v1  ;;  %93 = vmatprep.mubr.f32.mxu0 %v752_v2  ;;  %v22_v9 = vld [vmem:[%s846_s2] sm:$0xff]  ;;  %v798_v16 = vcombine.high %v791_v11, %v791_v11 }
   0x5   :  { %635 = vmatprep.subr.bf16.mxu0 %v707_v1  ;;  %615 = vmatprep.mubr.msk.f32.mxu1 %vm709_vm0, %v708_v3  ;;  %v23_v15 = vld [vmem:[%s847_s3] sm:$0xf]  ;;  %s711_s3 = smov [#allocation2]  }
   0x6   :  { %672 = vset.pattern.permute.xlu0 %v710_v17  ;;  %v24_v18 = vld [vmem:[%s848_s4] sm:$0xf]  ;;  %s515_s4 = sshll.u32 %s711_s3, 4  ;;  %s516_s4 = int_to_ptr.vmem [resolvable:$true] %s515_s4 }
   0x7   :  { %s683_s27 = scalar_lea.vmem %s516_s4, 256  ;;  %p688_p1 = scmp.lt.s32.totalorder %s516_s4, %s516_s4 }
   0x8   :  { %636 = vmatpush3.bf16.msra.mxu0 %v707_v1  ;;  %p684_p0 = scmp.ne.s32.totalorder %s516_s4, %s683_s27  ;;  %p689_p2 = scmp.lt.s32.totalorder %s683_s27, %s683_s27 }
   0x9   :  { %637 = vmatprep.subr.bf16.mxu0 %v707_v1 }
   0xa   :  { %p690_p3 = por %p689_p2, %p688_p1 }
   0xc   :  { %638 = vmatpush3.bf16.msra.mxu0 %v707_v1  ;;  %p691_p4 = pnand %p690_p3, %p684_p0 }
   0xd   :  { %639 = vmatprep.subr.bf16.mxu0 %v707_v1 }
  0x10   :  { %640 = vmatpush3.bf16.msra.mxu0 %v707_v1 }
  0x11   :  { %641 = vmatprep.subr.bf16.mxu0 %v707_v1 }
  0x14   :  { %642 = vmatpush3.bf16.msra.mxu0 %v707_v1 }
  0x15   :  { %643 = vmatprep.subr.bf16.mxu0 %v707_v1 }
  0x18   :  { %644 = vmatpush3.bf16.msra.mxu0 %v707_v1 }
  0x19   :  { %645 = vmatprep.subr.bf16.mxu0 %v707_v1 }
  0x1c   :  { %646 = vmatpush3.bf16.msra.mxu0 %v707_v1 }
  0x1d   :  { %647 = vmatprep.subr.bf16.mxu0 %v707_v1 }
  0x20   :  { %648 = vmatpush3.bf16.msra.mxu0 %v707_v1 }
  0x21   :  { %623 = vmatprep.subr.mxu0 %v708_v3 }
  0x23   :  { %94 = vmatmul.mubr.f32.vlgmr.msra.gmra.mrb[0].mxu0 %v747_v0 }
  0x24   :  { %625 = vmatprep.mubr.msk.f32.mxu0 %vm709_vm0, %v708_v3 }
  0xf6   :  { %v567_v4 = vpop.f32.mrb[0].mxu0 }
  0xf7   :  { %v568_v5 = vpop.f32.mrb[1].mxu0 }
  0xf8   :  { %v569_v6 = vadd.f32 %v568_v5, %v567_v4 }
  0xfa   :  { %v99_v7 = vmul.f32 0.00390625, %v569_v6 }
  0xfc   :  { %614 = vmatpush3.msk.msra.mxu1 %vm104_vm1, %v99_v7 }
  0xfd   :  { %616 = vmatmul.mubr.msk.f32.vlgmr.msra.gmra.mrb[0].mxu1 %vm100_vm2, %v21_v8  ;;  %618 = vmatprep.subr.mxu1 %v708_v3 }
  0xfe   :  { %620 = vmatprep.mubr.msk.f32.mxu1 %vm709_vm0, %v708_v3 }
 0x1d0   :  { %v174_v10 = vpop.f32.mrb[0].mxu1 }
 0x1d1   :  { %v175_v12 = vadd.f32 %v174_v10, %v22_v9  ;;  %v617_v13 = vpop.f32.mrb[1].mxu1 }
 0x1d3   :  { %v178_v14 = vmax.f32 %v175_v12, 0.0 }
 0x1d5   :  { %619 = vmatpush3.msra.mxu1 %v178_v14 }
 0x1d6   :  { %621 = vmatmul.mubr.msk.f32.vlgmr.msra.gmra.mrb[2].mxu1 %vm179_vm3, %v23_v15  ;;  %649 = vmatprep.subr.bf16.mxu1 %v707_v1 }
 0x1d7   :  { %650 = vmatpush3.bf16.msra.mxu1 %v707_v1  ;;  %340 = vmatprep.mubr.f32.mxu1 %v798_v16 }
 0x1d8   :  { %651 = vmatprep.subr.bf16.mxu1 %v707_v1 }
 0x1db   :  { %652 = vmatpush3.bf16.msra.mxu1 %v707_v1 }
 0x1dc   :  { %653 = vmatprep.subr.bf16.mxu1 %v707_v1 }
 0x1df   :  { %654 = vmatpush3.bf16.msra.mxu1 %v707_v1 }
 0x1e0   :  { %655 = vmatprep.subr.bf16.mxu1 %v707_v1 }
 0x1e3   :  { %656 = vmatpush3.bf16.msra.mxu1 %v707_v1 }
 0x1e4   :  { %657 = vmatprep.subr.bf16.mxu1 %v707_v1 }
 0x1e7   :  { %658 = vmatpush3.bf16.msra.mxu1 %v707_v1 }
 0x1e8   :  { %659 = vmatprep.subr.bf16.mxu1 %v707_v1 }
 0x1eb   :  { %660 = vmatpush3.bf16.msra.mxu1 %v707_v1 }
 0x1ec   :  { %661 = vmatprep.subr.bf16.mxu1 %v707_v1 }
 0x1ef   :  { %662 = vmatpush3.bf16.msra.mxu1 %v707_v1 }
 0x1f0   :  { %663 = vmatprep.subr.bf16.mxu1 %v707_v1 }
 0x1f3   :  { %664 = vmatpush3.bf16.msra.mxu1 %v707_v1 }
 0x1f6   :  { %341 = vmatmul.mubr.f32.vlgmr.msra.gmra.mrb[4].mxu1 %v791_v11 }
 0x2a9   :  { %v249_v19 = vpop.f32.mrb[2].mxu1 }
 0x2aa   :  { %v250_v20 = vadd.f32 %v249_v19, %v24_v18  ;;  %v622_v21 = vpop.f32.mrb[3].mxu1 }
 0x2ac   :  { %v529_v22 = vmul.f32 -1.442695, %v250_v20 }
 0x2ae   :  { %675 = vpow2.f32 %v529_v22 }
 0x2b8   :  { %v676_v23 = vpop.eup %675 }
 0x2b9   :  { %v256_v24 = vadd.f32 1.0, %v676_v23 }
 0x2bb   :  { %677 = vrcp.f32 %v256_v24 }
 0x2c5   :  { %v678_v25 = vpop.eup %677 }
 0x2c6   :  { %261 = vperm.xlu0 %672, %v678_v25  }
 0x2c9   :  { %v606_v26 = vpop.f32.mrb[4].mxu1 }
 0x2ca   :  { %v607_v27 = vpop.f32.mrb[5].mxu1 }
 0x2cb   :  { %v608_v28 = vadd.f32 %v607_v27, %v606_v26 }
 0x2cd   :  { %v346_v29 = vmul.f32 0.00390625, %v608_v28 }
 0x2cf   :  { %624 = vmatpush3.msk.msra.mxu0 %vm104_vm1, %v346_v29 }
 0x2d0   :  { %626 = vmatmul.mubr.msk.f32.vlgmr.msra.gmra.mrb[2].mxu0 %vm100_vm2, %v21_v8  ;;  %628 = vmatprep.subr.mxu0 %v708_v3 }
 0x2d1   :  { %630 = vmatprep.mubr.msk.f32.mxu0 %vm709_vm0, %v708_v3 }
 0x345   :  { %v262_v30 = vpop.permute.xlu0 %261 }
 0x346   :  { %v264_v31 = vmul.f32 %v262_v30, %v747_v0  ;;  %v265_v32 = vmul.f32 %v262_v30, %v752_v2 }
 0x348   :  { %v268_v33 = vcombine.low %v264_v31, %v265_v32 }
 0x34a   :  { %270 = vst [vmem:[#allocation2] sm:$0xff] %v268_v33 }
 0x3a3   :  { %v416_v34 = vpop.f32.mrb[2].mxu0 }
 0x3a4   :  { %v417_v35 = vadd.f32 %v416_v34, %v22_v9  ;;  %v627_v36 = vpop.f32.mrb[3].mxu0 }
 0x3a6   :  { %v420_v37 = vmax.f32 %v417_v35, 0.0 }
 0x3a8   :  { %629 = vmatpush3.msra.mxu0 %v420_v37 }
 0x3a9   :  { %631 = vmatmul.mubr.msk.f32.vlgmr.msra.gmra.mrb[4].mxu0 %vm179_vm3, %v23_v15 }
 0x47c   :  { %v487_v38 = vpop.f32.mrb[4].mxu0 }
 0x47d   :  { %v488_v39 = vadd.f32 %v487_v38, %v24_v18  ;;  %v632_v40 = vpop.f32.mrb[5].mxu0 }
 0x47f   :  { %v534_v41 = vmul.f32 -1.442695, %v488_v39 }
 0x481   :  { %679 = vpow2.f32 %v534_v41 }
 0x48b   :  { %v680_v42 = vpop.eup %679 }
 0x48c   :  { %v494_v43 = vadd.f32 1.0, %v680_v42 }
 0x48e   :  { %681 = vrcp.f32 %v494_v43 }
 0x498   :  { %v682_v44 = vpop.eup %681 }
 0x499   :  { %499 = vperm.xlu0 %672, %v682_v44  }
 0x518   :  { %v500_v45 = vpop.permute.xlu0 %499 }
 0x519   :  { %v502_v46 = vmul.f32 %v791_v11, %v500_v45  ;;  %v503_v47 = vmul.f32 %v500_v45, %v798_v16 }
 0x51b   :  { %v506_v48 = vcombine.low %v502_v46, %v503_v47 }
 0x51d   :  { %509 = vst [vmem:[#allocation2 + $0x8] sm:$0xff] %v506_v48 }
 0x51e   :  { %694 = shalt.err (!%p691_p4)
}
 0x51f   :  { %s695_s30 = scalar_lea.hbm %s849_s5, 256 }
 0x520   :  { %p696_p5 = scmp.ne.s32.totalorder %s849_s5, %s695_s30  ;;  %p699_p6 = scmp.lt.u32.totalorder %s695_s30, %s849_s5 }
 0x522   :  { %p701_p7 = pnand %p699_p6, %p696_p5 }
 0x524   :  { %704 = shalt.err (!%p701_p7)
}
 0x525   :  { %s712_s10 = smov 128   ;;  %s713_s11 = smov 8  }
 0x526   :  { %521 = dma.vmem_to_hbm [thread:$0]  %s516_s4, 256, %s849_s5, [#allocation3], %s712_s10, %s712_s10, %s713_s11  }
 0x527   :  { %705 = dma.done.wait [#allocation3], 256  }
 0x528   :  { %706 = vsyncadd [#allocation3], 4294967040 }
 0x529   :  { %525 = vsyncpa [#allocation3], 1 }

</bundles_post_ra>
